<compile_context>
chip_gen: v5e
topology: v5e:2x2
jax: 0.10.0
libtpu: 0.0.40
codegen_flags: <defaults>
</compile_context>

<pallas_src>
import functools

import jax
import jax.numpy as jnp
from jax import lax
from jax.experimental import pallas as pl
from jax.experimental.pallas import tpu as pltpu

LN_EPS = 1e-12  # nn.LayerNorm(hidden, eps=1e-12)


def _round_up(x, m):
    return ((x + m - 1) // m) * m


def _obj_color_encoder_kernel(x_ref, p_ref, o_ref, *, n_comp):
    # x_ref: (tm, n_comp*4)  rows = [w0,r0,g0,b0, w1,r1,g1,b1, ...]
    # p_ref: (6, H)          rows = [W[:,0], W[:,1], W[:,2], bias, gamma, beta]
    # o_ref: (tm, H)
    x = x_ref[...].astype(jnp.float32)   # no-op for f32 inputs
    p = p_ref[...].astype(jnp.float32)

    w0, w1, w2 = p[0:1, :], p[1:2, :], p[2:3, :]
    bias, gamma, beta = p[3:4, :], p[4:5, :], p[5:6, :]

    acc = jnp.zeros((x.shape[0], p.shape[1]), jnp.float32)
    for c in range(n_comp):  # static unroll over GMM components (C is tiny)
        base = 4 * c
        gmm_w = x[:, base:base + 1]            # (tm, 1) mixture weight
        m0 = x[:, base + 1:base + 2]
        m1 = x[:, base + 2:base + 3]
        m2 = x[:, base + 3:base + 4]

        # Linear(3, H): K=3 -> VPU broadcast FMAs, skip the MXU entirely.
        y = m0 * w0 + m1 * w1 + m2 * w2 + bias
        # ReLU
        y = jnp.maximum(y, 0.0)
        # LayerNorm over H (biased variance, eps=1e-12), f32 math.
        mean = jnp.mean(y, axis=-1, keepdims=True)
        centered = y - mean
        var = jnp.mean(centered * centered, axis=-1, keepdims=True)
        y = centered * lax.rsqrt(var + LN_EPS) * gamma + beta
        # Dropout (eval mode) = identity
        acc = acc + y * gmm_w

    o_ref[...] = acc.astype(o_ref.dtype)


@functools.partial(jax.jit, static_argnames=("tm",))
def _obj_color_encoder_impl(obj_colors, weight, bias, gamma, beta, *, tm):
    B, N, C, F = obj_colors.shape
    H = weight.shape[0]
    M = B * N
    M_pad = _round_up(M, tm)

    # Flatten rows; pad to a tile multiple (padded rows have gmm_weight == 0,
    # so they contribute nothing and are sliced off afterwards).
    x2d = obj_colors.reshape(M, C * F)
    if M_pad != M:
        x2d = jnp.pad(x2d, ((0, M_pad - M), (0, 0)))

    # Fuse all tiny parameters into one resident (6, H) array.
    params = jnp.concatenate(
        [weight.T,               # (3, H)
         bias.reshape(1, H),
         gamma.reshape(1, H),
         beta.reshape(1, H)],
        axis=0,
    ).astype(jnp.float32)        # (6, H)

    in_bytes = obj_colors.dtype.itemsize
    cost = pl.CostEstimate(
        flops=M * C * (2 * 3 * H + 12 * H),
        transcendentals=M * C,                       # one rsqrt per row/component
        bytes_accessed=M * C * F * in_bytes + M * H * in_bytes + 6 * H * 4,
    )

    out2d = pl.pallas_call(
        functools.partial(_obj_color_encoder_kernel, n_comp=C),
        out_shape=jax.ShapeDtypeStruct((M_pad, H), obj_colors.dtype),
        grid_spec=pltpu.PrefetchScalarGridSpec(
            num_scalar_prefetch=0,
            grid=(M_pad // tm,),
            in_specs=[
                pl.BlockSpec((tm, C * F), lambda i: (i, 0)),  # row tile
                pl.BlockSpec((6, H), lambda i: (0, 0)),       # fused params (resident)
            ],
            out_specs=pl.BlockSpec((tm, H), lambda i: (i, 0)),
        ),
        compiler_params=pltpu.CompilerParams(
            dimension_semantics=("parallel",),
            vmem_limit_bytes=32 * 1024 * 1024,   # safe on v5e/v6e/v7x for these tiles
        ),
        cost_estimate=cost,
    )(x2d, params)

    return out2d[:M].reshape(B, N, H)


def obj_color_encoder(obj_colors, weight, bias, gamma, beta, *, tm=1024):
    """obj_colors: (B, N, C, 4); weight: (H, 3); bias/gamma/beta: (H,)."""
    B, N, C, F = obj_colors.shape
    assert F == 4, "expects (gmm_weight, r, g, b) per component"
    M = B * N
    # Large tile to amortize per-step overhead (sweep 512..2048 at scale), but
    # clamp so the grid keeps >=2 steps (v7x has 2 TCs) and stays 8-aligned.
    tm_eff = int(min(tm, max(8, _round_up(pl.cdiv(M, 2), 8))))
    return _obj_color_encoder_impl(obj_colors, weight, bias, gamma, beta, tm=tm_eff)


def _reference(obj_colors, weight, bias, gamma, beta):
    gmm_w = obj_colors[..., :1]
    gmm_m = obj_colors[..., 1:]
    y = jnp.einsum("bncd,hd->bnch", gmm_m, weight) + bias
    y = jnp.maximum(y, 0.0)
    mean = jnp.mean(y, axis=-1, keepdims=True)
    var = jnp.mean((y - mean) ** 2, axis=-1, keepdims=True)
    y = (y - mean) / jnp.sqrt(var + LN_EPS) * gamma + beta
    return jnp.sum(y * gmm_w, axis=2)


if __name__ == "__main__":
    # ObjColorEncoder(hidden_size=32): obj_colors (B, N, C=3 GMM comps, 4)
    B, N, C, H = 2, 10, 3, 32   # N=10 also exercises the non-divisible-M path

    key = jax.random.PRNGKey(0)
    k_x, k_w, k_b, k_g, k_be = jax.random.split(key, 5)

    obj_colors = jax.random.normal(k_x, (B, N, C, 4), dtype=jnp.float32)
    weight = jax.random.normal(k_w, (H, 3), dtype=jnp.float32) * 0.1  # nn.Linear(3, H)
    bias = jax.random.normal(k_b, (H,), dtype=jnp.float32) * 0.1
    gamma = 1.0 + 0.05 * jax.random.normal(k_g, (H,), dtype=jnp.float32)
    beta = 0.05 * jax.random.normal(k_be, (H,), dtype=jnp.float32)

    out = obj_color_encoder(obj_colors, weight, bias, gamma, beta)
    out = jax.block_until_ready(out)

    ref = _reference(obj_colors, weight, bias, gamma, beta)
    assert out.shape == (B, N, H)
    assert jnp.allclose(out, ref, atol=1e-4, rtol=1e-4), "mismatch vs reference"

    print("KERNEL_OK")
</pallas_src>

<mosaic_0001>
module attributes {stable_mosaic.version = 11 : i64} {
  func.func @_obj_color_encoder_kernel(%arg0: i32, %arg1: memref<16x12xf32, #tpu.memory_space<vmem>>, %arg2: memref<6x32xf32, #tpu.memory_space<vmem>>, %arg3: memref<16x32xf32, #tpu.memory_space<vmem>>) attributes {dimension_semantics = [#tpu.dimension_semantics<parallel>], iteration_bounds = array<i64: 2>, scalar_prefetch = 0 : i64, scratch_operands = 0 : i64, tpu.core_type = #tpu.core_type<tc>, window_params = [{transform_indices = @transform_0, window_bounds = array<i64: 16, 12>}, {pipeline_mode = #tpu.pipeline_mode<synchronous>, transform_indices = @transform_1, window_bounds = array<i64: 6, 32>}, {transform_indices = @transform_2, window_bounds = array<i64: 16, 32>}]} {
    %c0 = arith.constant 0 : index
    %c0_0 = arith.constant 0 : index
    %0 = vector.load %arg1[%c0, %c0_0] : memref<16x12xf32, #tpu.memory_space<vmem>>, vector<16x12xf32>
    %c0_1 = arith.constant 0 : index
    %c0_2 = arith.constant 0 : index
    %1 = vector.load %arg2[%c0_1, %c0_2] : memref<6x32xf32, #tpu.memory_space<vmem>>, vector<6x32xf32>
    %2 = vector.extract_strided_slice %1 {offsets = [0, 0], sizes = [1, 32], strides = [1, 1]} : vector<6x32xf32> to vector<1x32xf32>
    %3 = vector.extract_strided_slice %1 {offsets = [1, 0], sizes = [1, 32], strides = [1, 1]} : vector<6x32xf32> to vector<1x32xf32>
    %4 = vector.extract_strided_slice %1 {offsets = [2, 0], sizes = [1, 32], strides = [1, 1]} : vector<6x32xf32> to vector<1x32xf32>
    %5 = vector.extract_strided_slice %1 {offsets = [3, 0], sizes = [1, 32], strides = [1, 1]} : vector<6x32xf32> to vector<1x32xf32>
    %6 = vector.extract_strided_slice %1 {offsets = [4, 0], sizes = [1, 32], strides = [1, 1]} : vector<6x32xf32> to vector<1x32xf32>
    %7 = vector.extract_strided_slice %1 {offsets = [5, 0], sizes = [1, 32], strides = [1, 1]} : vector<6x32xf32> to vector<1x32xf32>
    %cst = arith.constant 0.000000e+00 : f32
    %8 = vector.broadcast %cst : f32 to vector<16x32xf32>
    %9 = vector.extract_strided_slice %0 {offsets = [0, 0], sizes = [16, 1], strides = [1, 1]} : vector<16x12xf32> to vector<16x1xf32>
    %10 = vector.extract_strided_slice %0 {offsets = [0, 1], sizes = [16, 1], strides = [1, 1]} : vector<16x12xf32> to vector<16x1xf32>
    %11 = vector.extract_strided_slice %0 {offsets = [0, 2], sizes = [16, 1], strides = [1, 1]} : vector<16x12xf32> to vector<16x1xf32>
    %12 = vector.extract_strided_slice %0 {offsets = [0, 3], sizes = [16, 1], strides = [1, 1]} : vector<16x12xf32> to vector<16x1xf32>
    %13 = vector.broadcast %10 : vector<16x1xf32> to vector<16x32xf32>
    %14 = vector.broadcast %2 : vector<1x32xf32> to vector<16x32xf32>
    %15 = arith.mulf %13, %14 : vector<16x32xf32>
    %16 = vector.broadcast %11 : vector<16x1xf32> to vector<16x32xf32>
    %17 = vector.broadcast %3 : vector<1x32xf32> to vector<16x32xf32>
    %18 = arith.mulf %16, %17 : vector<16x32xf32>
    %19 = arith.addf %15, %18 : vector<16x32xf32>
    %20 = vector.broadcast %12 : vector<16x1xf32> to vector<16x32xf32>
    %21 = vector.broadcast %4 : vector<1x32xf32> to vector<16x32xf32>
    %22 = arith.mulf %20, %21 : vector<16x32xf32>
    %23 = arith.addf %19, %22 : vector<16x32xf32>
    %24 = vector.broadcast %5 : vector<1x32xf32> to vector<16x32xf32>
    %25 = arith.addf %23, %24 : vector<16x32xf32>
    %cst_3 = arith.constant 0.000000e+00 : f32
    %26 = vector.broadcast %cst_3 : f32 to vector<16x32xf32>
    %27 = arith.maximumf %25, %26 : vector<16x32xf32>
    %cst_4 = arith.constant dense<0.000000e+00> : vector<16xf32>
    %28 = vector.multi_reduction <add>, %27, %cst_4 [1] : vector<16x32xf32> to vector<16xf32>
    %29 = vector.shape_cast %28 : vector<16xf32> to vector<16x1xf32>
    %cst_5 = arith.constant 3.200000e+01 : f32
    %30 = vector.broadcast %cst_5 : f32 to vector<16x1xf32>
    %31 = arith.divf %29, %30 : vector<16x1xf32>
    %32 = vector.broadcast %31 : vector<16x1xf32> to vector<16x32xf32>
    %33 = arith.subf %27, %32 : vector<16x32xf32>
    %34 = arith.mulf %33, %33 : vector<16x32xf32>
    %cst_6 = arith.constant dense<0.000000e+00> : vector<16xf32>
    %35 = vector.multi_reduction <add>, %34, %cst_6 [1] : vector<16x32xf32> to vector<16xf32>
    %36 = vector.shape_cast %35 : vector<16xf32> to vector<16x1xf32>
    %cst_7 = arith.constant 3.200000e+01 : f32
    %37 = vector.broadcast %cst_7 : f32 to vector<16x1xf32>
    %38 = arith.divf %36, %37 : vector<16x1xf32>
    %cst_8 = arith.constant 9.99999996E-13 : f32
    %39 = vector.broadcast %cst_8 : f32 to vector<16x1xf32>
    %40 = arith.addf %38, %39 : vector<16x1xf32>
    %41 = math.rsqrt %40 : vector<16x1xf32>
    %42 = vector.broadcast %41 : vector<16x1xf32> to vector<16x32xf32>
    %43 = arith.mulf %33, %42 : vector<16x32xf32>
    %44 = vector.broadcast %6 : vector<1x32xf32> to vector<16x32xf32>
    %45 = arith.mulf %43, %44 : vector<16x32xf32>
    %46 = vector.broadcast %7 : vector<1x32xf32> to vector<16x32xf32>
    %47 = arith.addf %45, %46 : vector<16x32xf32>
    %48 = vector.broadcast %9 : vector<16x1xf32> to vector<16x32xf32>
    %49 = arith.mulf %47, %48 : vector<16x32xf32>
    %50 = arith.addf %8, %49 : vector<16x32xf32>
    %51 = vector.extract_strided_slice %0 {offsets = [0, 4], sizes = [16, 1], strides = [1, 1]} : vector<16x12xf32> to vector<16x1xf32>
    %52 = vector.extract_strided_slice %0 {offsets = [0, 5], sizes = [16, 1], strides = [1, 1]} : vector<16x12xf32> to vector<16x1xf32>
    %53 = vector.extract_strided_slice %0 {offsets = [0, 6], sizes = [16, 1], strides = [1, 1]} : vector<16x12xf32> to vector<16x1xf32>
    %54 = vector.extract_strided_slice %0 {offsets = [0, 7], sizes = [16, 1], strides = [1, 1]} : vector<16x12xf32> to vector<16x1xf32>
    %55 = vector.broadcast %52 : vector<16x1xf32> to vector<16x32xf32>
    %56 = vector.broadcast %2 : vector<1x32xf32> to vector<16x32xf32>
    %57 = arith.mulf %55, %56 : vector<16x32xf32>
    %58 = vector.broadcast %53 : vector<16x1xf32> to vector<16x32xf32>
    %59 = vector.broadcast %3 : vector<1x32xf32> to vector<16x32xf32>
    %60 = arith.mulf %58, %59 : vector<16x32xf32>
    %61 = arith.addf %57, %60 : vector<16x32xf32>
    %62 = vector.broadcast %54 : vector<16x1xf32> to vector<16x32xf32>
    %63 = vector.broadcast %4 : vector<1x32xf32> to vector<16x32xf32>
    %64 = arith.mulf %62, %63 : vector<16x32xf32>
    %65 = arith.addf %61, %64 : vector<16x32xf32>
    %66 = vector.broadcast %5 : vector<1x32xf32> to vector<16x32xf32>
    %67 = arith.addf %65, %66 : vector<16x32xf32>
    %cst_9 = arith.constant 0.000000e+00 : f32
    %68 = vector.broadcast %cst_9 : f32 to vector<16x32xf32>
    %69 = arith.maximumf %67, %68 : vector<16x32xf32>
    %cst_10 = arith.constant dense<0.000000e+00> : vector<16xf32>
    %70 = vector.multi_reduction <add>, %69, %cst_10 [1] : vector<16x32xf32> to vector<16xf32>
    %71 = vector.shape_cast %70 : vector<16xf32> to vector<16x1xf32>
    %cst_11 = arith.constant 3.200000e+01 : f32
    %72 = vector.broadcast %cst_11 : f32 to vector<16x1xf32>
    %73 = arith.divf %71, %72 : vector<16x1xf32>
    %74 = vector.broadcast %73 : vector<16x1xf32> to vector<16x32xf32>
    %75 = arith.subf %69, %74 : vector<16x32xf32>
    %76 = arith.mulf %75, %75 : vector<16x32xf32>
    %cst_12 = arith.constant dense<0.000000e+00> : vector<16xf32>
    %77 = vector.multi_reduction <add>, %76, %cst_12 [1] : vector<16x32xf32> to vector<16xf32>
    %78 = vector.shape_cast %77 : vector<16xf32> to vector<16x1xf32>
    %cst_13 = arith.constant 3.200000e+01 : f32
    %79 = vector.broadcast %cst_13 : f32 to vector<16x1xf32>
    %80 = arith.divf %78, %79 : vector<16x1xf32>
    %cst_14 = arith.constant 9.99999996E-13 : f32
    %81 = vector.broadcast %cst_14 : f32 to vector<16x1xf32>
    %82 = arith.addf %80, %81 : vector<16x1xf32>
    %83 = math.rsqrt %82 : vector<16x1xf32>
    %84 = vector.broadcast %83 : vector<16x1xf32> to vector<16x32xf32>
    %85 = arith.mulf %75, %84 : vector<16x32xf32>
    %86 = vector.broadcast %6 : vector<1x32xf32> to vector<16x32xf32>
    %87 = arith.mulf %85, %86 : vector<16x32xf32>
    %88 = vector.broadcast %7 : vector<1x32xf32> to vector<16x32xf32>
    %89 = arith.addf %87, %88 : vector<16x32xf32>
    %90 = vector.broadcast %51 : vector<16x1xf32> to vector<16x32xf32>
    %91 = arith.mulf %89, %90 : vector<16x32xf32>
    %92 = arith.addf %50, %91 : vector<16x32xf32>
    %93 = vector.extract_strided_slice %0 {offsets = [0, 8], sizes = [16, 1], strides = [1, 1]} : vector<16x12xf32> to vector<16x1xf32>
    %94 = vector.extract_strided_slice %0 {offsets = [0, 9], sizes = [16, 1], strides = [1, 1]} : vector<16x12xf32> to vector<16x1xf32>
    %95 = vector.extract_strided_slice %0 {offsets = [0, 10], sizes = [16, 1], strides = [1, 1]} : vector<16x12xf32> to vector<16x1xf32>
    %96 = vector.extract_strided_slice %0 {offsets = [0, 11], sizes = [16, 1], strides = [1, 1]} : vector<16x12xf32> to vector<16x1xf32>
    %97 = vector.broadcast %94 : vector<16x1xf32> to vector<16x32xf32>
    %98 = vector.broadcast %2 : vector<1x32xf32> to vector<16x32xf32>
    %99 = arith.mulf %97, %98 : vector<16x32xf32>
    %100 = vector.broadcast %95 : vector<16x1xf32> to vector<16x32xf32>
    %101 = vector.broadcast %3 : vector<1x32xf32> to vector<16x32xf32>
    %102 = arith.mulf %100, %101 : vector<16x32xf32>
    %103 = arith.addf %99, %102 : vector<16x32xf32>
    %104 = vector.broadcast %96 : vector<16x1xf32> to vector<16x32xf32>
    %105 = vector.broadcast %4 : vector<1x32xf32> to vector<16x32xf32>
    %106 = arith.mulf %104, %105 : vector<16x32xf32>
    %107 = arith.addf %103, %106 : vector<16x32xf32>
    %108 = vector.broadcast %5 : vector<1x32xf32> to vector<16x32xf32>
    %109 = arith.addf %107, %108 : vector<16x32xf32>
    %cst_15 = arith.constant 0.000000e+00 : f32
    %110 = vector.broadcast %cst_15 : f32 to vector<16x32xf32>
    %111 = arith.maximumf %109, %110 : vector<16x32xf32>
    %cst_16 = arith.constant dense<0.000000e+00> : vector<16xf32>
    %112 = vector.multi_reduction <add>, %111, %cst_16 [1] : vector<16x32xf32> to vector<16xf32>
    %113 = vector.shape_cast %112 : vector<16xf32> to vector<16x1xf32>
    %cst_17 = arith.constant 3.200000e+01 : f32
    %114 = vector.broadcast %cst_17 : f32 to vector<16x1xf32>
    %115 = arith.divf %113, %114 : vector<16x1xf32>
    %116 = vector.broadcast %115 : vector<16x1xf32> to vector<16x32xf32>
    %117 = arith.subf %111, %116 : vector<16x32xf32>
    %118 = arith.mulf %117, %117 : vector<16x32xf32>
    %cst_18 = arith.constant dense<0.000000e+00> : vector<16xf32>
    %119 = vector.multi_reduction <add>, %118, %cst_18 [1] : vector<16x32xf32> to vector<16xf32>
    %120 = vector.shape_cast %119 : vector<16xf32> to vector<16x1xf32>
    %cst_19 = arith.constant 3.200000e+01 : f32
    %121 = vector.broadcast %cst_19 : f32 to vector<16x1xf32>
    %122 = arith.divf %120, %121 : vector<16x1xf32>
    %cst_20 = arith.constant 9.99999996E-13 : f32
    %123 = vector.broadcast %cst_20 : f32 to vector<16x1xf32>
    %124 = arith.addf %122, %123 : vector<16x1xf32>
    %125 = math.rsqrt %124 : vector<16x1xf32>
    %126 = vector.broadcast %125 : vector<16x1xf32> to vector<16x32xf32>
    %127 = arith.mulf %117, %126 : vector<16x32xf32>
    %128 = vector.broadcast %6 : vector<1x32xf32> to vector<16x32xf32>
    %129 = arith.mulf %127, %128 : vector<16x32xf32>
    %130 = vector.broadcast %7 : vector<1x32xf32> to vector<16x32xf32>
    %131 = arith.addf %129, %130 : vector<16x32xf32>
    %132 = vector.broadcast %93 : vector<16x1xf32> to vector<16x32xf32>
    %133 = arith.mulf %131, %132 : vector<16x32xf32>
    %134 = arith.addf %92, %133 : vector<16x32xf32>
    %c0_21 = arith.constant 0 : index
    %c0_22 = arith.constant 0 : index
    %135 = vector.load %arg3[%c0_21, %c0_22] : memref<16x32xf32, #tpu.memory_space<vmem>>, vector<16x32xf32>
    tpu.vector_store %arg3[%c0_21, %c0_22], %134 {strides = array<i32>} : memref<16x32xf32, #tpu.memory_space<vmem>>, vector<16x32xf32>,
    return
  }
  func.func @transform_0(%arg0: i32) -> (i32, i32) {
    %c0_i32 = arith.constant 0 : i32
    %c0_i32_0 = arith.constant 0 : i32
    return %arg0, %c0_i32 : i32, i32
  }
  func.func @transform_1(%arg0: i32) -> (i32, i32) {
    %c0_i32 = arith.constant 0 : i32
    %c0_i32_0 = arith.constant 0 : i32
    %c0_i32_1 = arith.constant 0 : i32
    return %c0_i32, %c0_i32_0 : i32, i32
  }
  func.func @transform_2(%arg0: i32) -> (i32, i32) {
    %c0_i32 = arith.constant 0 : i32
    %c0_i32_0 = arith.constant 0 : i32
    return %arg0, %c0_i32 : i32, i32
  }
}

</mosaic_0001>

<bundles_post_ra>
// kernel: _obj_color_encoder_impl.1
= control target key start
LH: loop header
LB: loop body
LE: loop exit
PB: predicated region body
PF: predicated region fallthrough
CT: control target
= control target key end

     0   :  { %s618_s9 = smov 0   ;;  %s816_s0 = inlined_call_operand.vmem [shape: f32[32,12], index: 0, kind: input, shape index: {}]   ;;  %s817_s1 = inlined_call_operand.vmem [shape: f32[6,32], index: 1, kind: input, shape index: {}]   ;;  %s818_s2 = inlined_call_operand.vmem [shape: f32[32,32], index: 2, kind: output, shape index: {}]  }
   0x1 LB: > { %s518_s10 = sadd.s32 4294967295, %s588_s9   ;;  %p522_p0 = scmp.ge.s32.totalorder %s588_s9, 1  ;;  %s588_s9 = sphi %s618_s9, %s12_s9  }
   0x2   : > { %p113_p1 = scmp.lt.s32.totalorder %s588_s9, 3 }
   0x4   : > { %p114_p2 = pnand %p522_p0, %p113_p1 }
   0x5   : > { %s523_s11 = sshll.u32 (!%p114_p2), %s518_s10, 1 }
   0x6   : > { %117 = sbr.rel (%p114_p2) target bundleno = 464 (0x1d0), region = 28  ;;  %p136_p3 = scmp.lt.s32.totalorder (!%p114_p2), %s523_s11, 3 }
   0xb   : > { %v590_v0 = vmov 2   ;;  %v591_v1 = vmov 1   ;;  %v592_v2 = vmov 3   ;;  %s824_s11 = smov (!%p136_p3, %s523_s11), 3  ;;  %v593_v5 = vmov 5  }
   0xc   : > { %551 = vset.pattern.permute.xlu1 %v590_v0  ;;  %550 = vset.pattern.permute.xlu0 %v591_v1  ;;  %s524_s12 = sshll.u32 %s824_s11, 3  ;;  %v594_v6 = vmov 0   ;;  %v595_v7 = vmov 6   ;;  %v596_v8 = vmov 10   ;;  %v597_v9 = vmov 7  }
   0xd   : > { %552 = vset.pattern.permute.xlu2 %v592_v2  ;;  %s139_s15 = scalar_lea.vmem %s816_s0, %s524_s12  ;;  %v598_v10 = vmov 9   ;;  %v599_v11 = vmov 11   ;;  %v660_v14 = vld [vmem:[%s817_s1] sm:$0x3f]  ;;  %vm194_vm0 = vcmask 261120   ;;  %v600_v55 = vmov 4   ;;  %s145_s20 = scalar_lea.vmem %s818_s2, %s524_s12 }
   0xe   : > { %v634_v3 = vld [vmem:[%s139_s15] sm:$0xff]  ;;  %v639_v4 = vld [vmem:[%s139_s15 + $0x8] sm:$0xff]  ;;  %v663_v16 = vperm.slane %v660_v14, 2  ;;  %v666_v17 = vperm.slane %v660_v14, 1  ;;  %v669_v18 = vperm.slane %v660_v14, 0  ;;  %v675_v26 = vperm.slane %v660_v14, 3 }
   0xf   : > { %164 = vperm.xlu1 %551, %v634_v3   ;;  %152 = vperm.xlu0 %550, %v634_v3  }
  0x10   : > { %177 = vperm.xlu2 %552, %v634_v3  }
  0x17   : > { %168 = vperm.xlu1 %551, %v639_v4   ;;  %157 = vperm.xlu0 %550, %v639_v4  }
  0x18   : > { %181 = vperm.xlu2 %552, %v639_v4  }
  0x1f   : > { %554 = vset.pattern.permute.xlu1 %v593_v5  ;;  %553 = vset.pattern.permute.xlu0 %v594_v6 }
  0x20   : > { %555 = vset.pattern.permute.xlu2 %v595_v7  ;;  %265 = vperm.xlu1 %554, %v634_v3  }
  0x21   : > { %253 = vperm.xlu0 %553, %v634_v3   ;;  %275 = vperm.xlu2 %555, %v634_v3  }
  0x28   : > { %269 = vperm.xlu1 %554, %v639_v4  }
  0x29   : > { %558 = vset.pattern.permute.xlu0 %v596_v8  ;;  %279 = vperm.xlu2 %555, %v639_v4  }
  0x2a   : > { %373 = vperm.xlu0 %558, %v634_v3  }
  0x30   : > { %556 = vset.pattern.permute.xlu1 %v597_v9 }
  0x31   : > { %557 = vset.pattern.permute.xlu2 %v598_v10  ;;  %287 = vperm.xlu1 %556, %v634_v3  }
  0x32   : > { %363 = vperm.xlu2 %557, %v634_v3   ;;  %561 = vset.pattern.permute.xlu0 %v599_v11 }
  0x33   : > { %389 = vperm.xlu0 %561, %v639_v4  }
  0x39   : > { %291 = vperm.xlu1 %556, %v639_v4  }
  0x3a   : > { %367 = vperm.xlu2 %557, %v639_v4  }
  0x3b   : > { %564 = vset.pattern.permute.xlu0 %v600_v55 }
  0x41   : > { %559 = vset.pattern.permute.xlu1 %v596_v8 }
  0x42   : > { %560 = vset.pattern.permute.xlu2 %v599_v11  ;;  %377 = vperm.xlu1 %559, %v639_v4  }
  0x43   : > { %385 = vperm.xlu2 %560, %v634_v3  }
  0x4a   : > { %562 = vset.pattern.permute.xlu1 %v594_v6 }
  0x4b   : > { %563 = vset.pattern.permute.xlu2 %v600_v55 }
  0x6a   : > { %v178_v12 = vpop.permute.xlu2 %177 }
  0x6b   : > { %v185_v21 = vmul.f32 %v663_v16, %v178_v12 }
  0x72   : > { %v182_v13 = vpop.permute.xlu2 %181 }
  0x73   : > { %v186_v34 = vmul.f32 %v663_v16, %v182_v13 }
  0x7b   : > { %v276_v15 = vpop.permute.xlu2 %275 }
  0x7c   : > { %v282_v52 = vmul.f32 %v276_v15, %v666_v17 }
  0x81   : > { %v165_v19 = vpop.permute.xlu1 %164  ;;  %v153_v20 = vpop.permute.xlu0 %152 }
  0x82   : > { %v172_v22 = vmul.f32 %v666_v17, %v165_v19  ;;  %v161_v23 = vmul.f32 %v669_v18, %v153_v20 }
  0x83   : > { %v280_v24 = vpop.permute.xlu2 %279 }
  0x84   : > { %v174_v25 = vadd.f32 %v172_v22, %v161_v23  ;;  %v283_v1 = vmul.f32 %v280_v24, %v666_v17 }
  0x86   : > { %v187_v27 = vadd.f32 %v185_v21, %v174_v25 }
  0x88   : > { %v678_v28 = vadd.f32 %v675_v26, %v187_v27 }
  0x89   : > { %v169_v29 = vpop.permute.xlu1 %168  ;;  %v158_v30 = vpop.permute.xlu0 %157 }
  0x8a   : > { %v173_v31 = vmul.f32 %v666_v17, %v169_v29  ;;  %v162_v32 = vmul.f32 %v669_v18, %v158_v30  ;;  %v192_v33 = vmax.f32 %v678_v28, 0.0  ;;  %v601_v29 = vmov 32.0  }
  0x8b   : > { %568 = vrcp.f32 %v601_v29 }
  0x8c   : > { %v175_v35 = vadd.f32 %v173_v31, %v162_v32  ;;  %v364_v36 = vpop.permute.xlu2 %363  ;;  %v195_v37 = vsel %vm194_vm0, %v192_v33, 0.0 }
  0x8d   : > { %196 = vadd.xlane.f32.xlu0 %v195_v37  ;;  %v370_v46 = vmul.f32 %v364_v36, %v669_v18 }
  0x8e   : > { %v188_v38 = vadd.f32 %v186_v34, %v175_v35 }
  0x90   : > { %v688_v39 = vadd.f32 %v675_v26, %v188_v38 }
  0x92   : > { %v266_v40 = vpop.permute.xlu1 %265  ;;  %v193_v41 = vmax.f32 %v688_v39, 0.0 }
  0x93   : > { %v691_v42 = vpop.permute.xlu0 %253  ;;  %v272_v53 = vmul.f32 %v266_v40, %v669_v18 }
  0x94   : > { %v368_v43 = vpop.permute.xlu2 %367  ;;  %v198_v44 = vsel %vm194_vm0, %v193_v41, 0.0 }
  0x95   : > { %199 = vadd.xlane.f32.xlu1 %v198_v44  ;;  %v284_v58 = vadd.f32 %v282_v52, %v272_v53  ;;  %v371_v19 = vmul.f32 %v368_v43, %v669_v18 }
  0x9a   : > { %v270_v45 = vpop.permute.xlu1 %269 }
  0x9b   : > { %v273_v63 = vmul.f32 %v270_v45, %v669_v18  ;;  %v569_v18 = vpop.eup %568 }
  0x9c   : > { %v374_v47 = vpop.permute.xlu0 %373  ;;  %v202_v30 = vmul.f32 32.0, %v569_v18  ;;  %vm206_vm1 = vweird.f32 %v569_v18 }
  0x9d   : > { %v380_v48 = vmul.f32 %v374_v47, %v666_v17  ;;  %v386_v49 = vpop.permute.xlu2 %385  ;;  %v285_v6 = vadd.f32 %v283_v1, %v273_v63 }
  0x9e   : > { %v392_v50 = vmul.f32 %v386_v49, %v663_v16 }
  0x9f   : > { %v382_v51 = vadd.f32 %v380_v48, %v370_v46 }
  0xa1   : > { %v394_v54 = vadd.f32 %v392_v50, %v382_v51 }
  0xa3   : > { %v288_v56 = vpop.permute.xlu1 %287  ;;  %v702_v57 = vadd.f32 %v394_v54, %v675_v26 }
  0xa4   : > { %v294_v59 = vmul.f32 %v288_v56, %v663_v16 }
  0xa5   : > { %v398_v60 = vmax.f32 %v702_v57, 0.0  ;;  %v390_v12 = vpop.permute.xlu0 %389 }
  0xa6   : > { %v296_v61 = vadd.f32 %v294_v59, %v284_v58  ;;  %v393_v21 = vmul.f32 %v390_v12, %v663_v16 }
  0xa7   : > { %v400_v62 = vsel %vm194_vm0, %v398_v60, 0.0 }
  0xa8   : > { %401 = vadd.xlane.f32.xlu0 %v400_v62  ;;  %v298_v0 = vadd.f32 %v296_v61, %v675_v26 }
  0xaa   : > { %v300_v2 = vmax.f32 %v298_v0, 0.0 }
  0xab   : > { %v292_v5 = vpop.permute.xlu1 %291 }
  0xac   : > { %v295_v7 = vmul.f32 %v292_v5, %v663_v16  ;;  %v302_v8 = vsel %vm194_vm0, %v300_v2, 0.0 }
  0xad   : > { %303 = vadd.xlane.f32.xlu1 %v302_v8 }
  0xae   : > { %v297_v9 = vadd.f32 %v295_v7, %v285_v6 }
  0xb0   : > { %v299_v10 = vadd.f32 %v297_v9, %v675_v26 }
  0xb2   : > { %v301_v11 = vmax.f32 %v299_v10, 0.0 }
  0xb4   : > { %v378_v13 = vpop.permute.xlu1 %377  ;;  %v305_v15 = vsel %vm194_vm0, %v301_v11, 0.0 }
  0xb5   : > { %v381_v20 = vmul.f32 %v378_v13, %v666_v17  ;;  %306 = vadd.xlane.f32.xlu2 %v305_v15  ;;  %v203_v17 = vsub.f32 1.0, %v202_v30 }
  0xb7   : > { %v383_v22 = vadd.f32 %v381_v20, %v371_v19  ;;  %v204_v31 = vmul.f32 %v569_v18, %v203_v17 }
  0xb9   : > { %v395_v23 = vadd.f32 %v393_v21, %v383_v22  ;;  %v205_v32 = vadd.f32 %v569_v18, %v204_v31 }
  0xbb   : > { %v397_v24 = vadd.f32 %v395_v23, %v675_v26  ;;  %v721_v16 = vsel %vm206_vm1, %v569_v18, %v205_v32 }
  0xbd   : > { %v399_v25 = vmax.f32 %v397_v24, 0.0 }
  0xbf   : > { %v403_v27 = vsel %vm194_vm0, %v399_v25, 0.0 }
  0xc0   : > { %404 = vadd.xlane.f32.xlu1 %v403_v27 }
  0xcd   : > { %351 = vperm.xlu2 %563, %v634_v3  }
  0xd9   : > { %257 = vperm.xlu1 %562, %v639_v4  }
 0x100   : > { %v197_v34 = vpop.xlane.xlu0 %196 }
 0x101   : > { %v208_v26 = vmul.f32 %v721_v16, %v197_v34 }
 0x103   : > { %v726_v35 = vsub.f32 %v192_v33, %v208_v26  ;;  %v602_v33 = vmov 8  }
 0x104   : > { %565 = vset.pattern.permute.xlu1 %v602_v33  ;;  %566 = vset.pattern.permute.xlu2 %v602_v33 }
 0x105   : > { %v212_v36 = vmul.f32 %v726_v35, %v726_v35 }
 0x107   : > { %v214_v37 = vsel %vm194_vm0, %v212_v36, 0.0 }
 0x108   : > { %v200_v38 = vpop.xlane.xlu1 %199  ;;  %215 = vadd.xlane.f32.xlu2 %v214_v37 }
 0x109   : > { %v209_v40 = vmul.f32 %v721_v16, %v200_v38 }
 0x10b   : > { %v734_v43 = vsub.f32 %v193_v41, %v209_v40 }
 0x10d   : > { %v213_v44 = vmul.f32 %v734_v43, %v734_v43 }
 0x10f   : > { %v217_v28 = vsel %vm194_vm0, %v213_v44, 0.0 }
 0x110   : > { %218 = vadd.xlane.f32.xlu2 %v217_v28 }
 0x11b   : > { %v402_v45 = vpop.xlane.xlu0 %401 }
 0x11c   : > { %v406_v48 = vmul.f32 %v402_v45, %v721_v16 }
 0x11e   : > { %v745_v41 = vsub.f32 %v398_v60, %v406_v48 }
 0x120   : > { %v304_v46 = vpop.xlane.xlu1 %303  ;;  %v410_v54 = vmul.f32 %v745_v41, %v745_v41 }
 0x121   : > { %v308_v47 = vmul.f32 %v304_v46, %v721_v16 }
 0x122   : > { %v412_v57 = vsel %vm194_vm0, %v410_v54, 0.0 }
 0x123   : > { %v741_v49 = vsub.f32 %v300_v2, %v308_v47 }
 0x125   : > { %v312_v39 = vmul.f32 %v741_v49, %v741_v49 }
 0x127   : > { %v314_v50 = vsel %vm194_vm0, %v312_v39, 0.0 }
 0x128   : > { %v307_v51 = vpop.xlane.xlu2 %306  ;;  %315 = vadd.xlane.f32.xlu2 %v314_v50 }
 0x129   : > { %v309_v52 = vmul.f32 %v307_v51, %v721_v16 }
 0x12b   : > { %v749_v53 = vsub.f32 %v301_v11, %v309_v52 }
 0x12d   : > { %v313_v55 = vmul.f32 %v749_v53, %v749_v53 }
 0x12f   : > { %v317_v56 = vsel %vm194_vm0, %v313_v55, 0.0  ;;  %v246_v55 = vperm.slane %v660_v14, 4 }
 0x130   : > { %318 = vadd.xlane.f32.xlu1 %v317_v56  ;;  %413 = vadd.xlane.f32.xlu2 %v412_v57  ;;  %v766_v63 = vpop.permute.xlu2 %351 }
 0x133   : > { %v405_v58 = vpop.xlane.xlu1 %404 }
 0x134   : > { %v407_v59 = vmul.f32 %v405_v58, %v721_v16 }
 0x136   : > { %v758_v60 = vsub.f32 %v399_v25, %v407_v59 }
 0x138   : > { %v411_v61 = vmul.f32 %v758_v60, %v758_v60 }
 0x13a   : > { %v415_v62 = vsel %vm194_vm0, %v411_v61, 0.0  ;;  %v249_v61 = vperm.slane %v660_v14, 5 }
 0x13b   : > { %416 = vadd.xlane.f32.xlu0 %v415_v62 }
 0x148   : > { %453 = vperm.xlu2 %566, %v639_v4  }
 0x149   : > { %449 = vperm.xlu1 %565, %v634_v3  }
 0x14b   : > { %v770_v9 = vpop.permute.xlu1 %257 }
 0x14f   : > { %355 = vperm.xlu0 %564, %v639_v4  }
 0x157   : > { %567 = vset.pattern.permute.xlu0 %v602_v33 }
 0x17b   : > { %v216_v0 = vpop.xlane.xlu2 %215 }
 0x17c   : > { %v220_v1 = vmul.f32 %v216_v0, %v721_v16 }
 0x17e   : > { %v222_v2 = vadd.f32 1e-12, %v220_v1 }
 0x180   : > { %570 = vrsqrt.f32 %v222_v2  ;;  %vm230_vm4 = vweird.f32 %v222_v2 }
 0x183   : > { %v219_v5 = vpop.xlane.xlu2 %218 }
 0x184   : > { %v221_v6 = vmul.f32 %v219_v5, %v721_v16 }
 0x186   : > { %v571_v7 = vpop.eup %570  ;;  %v223_v8 = vadd.f32 1e-12, %v221_v6 }
 0x187   : > { %v225_v11 = vmul.f32 %v571_v7, %v222_v2  ;;  %vm231_vm2 = vweird.f32 %v571_v7 }
 0x188   : > { %572 = vrsqrt.f32 %v223_v8  ;;  %vm232_vm5 = vmor %vm230_vm4, %vm231_vm2  ;;  %vm240_vm10 = vweird.f32 %v223_v8 }
 0x189   : > { %v226_v12 = vmul.f32 %v571_v7, %v225_v11 }
 0x18b   : > { %v227_v20 = vmul.f32 0.5, %v226_v12 }
 0x18d   : > { %v228_v18 = vsub.f32 1.5, %v227_v20 }
 0x18e   : > { %v773_v13 = vpop.eup %572 }
 0x18f   : > { %v235_v24 = vmul.f32 %v773_v13, %v223_v8  ;;  %v229_v32 = vmul.f32 %v571_v7, %v228_v18  ;;  %vm241_vm8 = vweird.f32 %v773_v13 }
 0x190   : > { %vm785_vm12 = vmor %vm240_vm10, %vm241_vm8 }
 0x191   : > { %v236_v17 = vmul.f32 %v773_v13, %v235_v24  ;;  %v233_v33 = vsel %vm232_vm5, %v571_v7, %v229_v32 }
 0x192   : > { %v244_v52 = vmul.f32 %v233_v33, %v726_v35 }
 0x193   : > { %v237_v36 = vmul.f32 0.5, %v236_v17 }
 0x194   : > { %v247_v62 = vmul.f32 %v246_v55, %v244_v52 }
 0x195   : > { %v238_v39 = vsub.f32 1.5, %v237_v36 }
 0x196   : > { %v250_v14 = vadd.f32 %v249_v61, %v247_v62 }
 0x197   : > { %v239_v58 = vmul.f32 %v773_v13, %v238_v39 }
 0x199   : > { %v243_v6 = vsel %vm785_vm12, %v773_v13, %v239_v58  ;;  %v260_v13 = vmul.f32 %v691_v42, %v250_v14 }
 0x19b   : > { %v316_v10 = vpop.xlane.xlu2 %315 }
 0x19c   : > { %v320_v3 = vmul.f32 %v316_v10, %v721_v16 }
 0x19e   : > { %v322_v4 = vadd.f32 1e-12, %v320_v3 }
 0x1a0   : > { %574 = vrsqrt.f32 %v322_v4  ;;  %vm330_vm6 = vweird.f32 %v322_v4 }
 0x1a3   : > { %v319_v15 = vpop.xlane.xlu1 %318  ;;  %v414_v19 = vpop.xlane.xlu2 %413 }
 0x1a4   : > { %v321_v21 = vmul.f32 %v319_v15, %v721_v16  ;;  %v418_v22 = vmul.f32 %v414_v19, %v721_v16 }
 0x1a6   : > { %v575_v23 = vpop.eup %574  ;;  %v323_v25 = vadd.f32 1e-12, %v321_v21  ;;  %v420_v27 = vadd.f32 1e-12, %v418_v22 }
 0x1a7   : > { %v325_v29 = vmul.f32 %v575_v23, %v322_v4  ;;  %vm331_vm3 = vweird.f32 %v575_v23  ;;  %v245_v4 = vmul.f32 %v243_v6, %v734_v43 }
 0x1a8   : > { %576 = vrsqrt.f32 %v323_v25  ;;  %vm332_vm7 = vmor %vm330_vm6, %vm331_vm3  ;;  %vm340_vm13 = vweird.f32 %v323_v25  ;;  %vm428_vm15 = vweird.f32 %v420_v27 }
 0x1a9   : > { %v326_v30 = vmul.f32 %v575_v23, %v325_v29  ;;  %578 = vrsqrt.f32 %v420_v27 }
 0x1ab   : > { %v327_v31 = vmul.f32 0.5, %v326_v30  ;;  %v454_v32 = vpop.permute.xlu2 %453 }
 0x1ad   : > { %v328_v34 = vsub.f32 1.5, %v327_v31 }
 0x1ae   : > { %v577_v26 = vpop.eup %576  ;;  %v417_v37 = vpop.xlane.xlu0 %416 }
 0x1af   : > { %v579_v38 = vpop.eup %578  ;;  %v329_v40 = vmul.f32 %v575_v23, %v328_v34  ;;  %v335_v44 = vmul.f32 %v577_v26, %v323_v25  ;;  %v419_v28 = vmul.f32 %v417_v37, %v721_v16  ;;  %vm341_vm9 = vweird.f32 %v577_v26 }
 0x1b0   : > { %v423_v45 = vmul.f32 %v579_v38, %v420_v27  ;;  %vm429_vm11 = vweird.f32 %v579_v38  ;;  %vm790_vm14 = vmor %vm340_vm13, %vm341_vm9  ;;  %v248_v27 = vmul.f32 %v246_v55, %v245_v4 }
 0x1b1   : > { %v333_v46 = vsel %vm332_vm7, %v575_v23, %v329_v40  ;;  %v336_v47 = vmul.f32 %v577_v26, %v335_v44  ;;  %v421_v48 = vadd.f32 1e-12, %v419_v28  ;;  %vm430_vm1 = vmor %vm428_vm15, %vm429_vm11 }
 0x1b2   : > { %v344_v50 = vmul.f32 %v333_v46, %v741_v49  ;;  %v424_v51 = vmul.f32 %v579_v38, %v423_v45  ;;  %v251_v42 = vadd.f32 %v249_v61, %v248_v27 }
 0x1b3   : > { %v337_v54 = vmul.f32 0.5, %v336_v47  ;;  %580 = vrsqrt.f32 %v421_v48  ;;  %vm438_vm3 = vweird.f32 %v421_v48 }
 0x1b4   : > { %v425_v56 = vmul.f32 0.5, %v424_v51  ;;  %v346_v57 = vmul.f32 %v344_v50, %v246_v55  ;;  %v261_v34 = vmul.f32 %v770_v9, %v251_v42 }
 0x1b5   : > { %v338_v16 = vsub.f32 1.5, %v337_v54 }
 0x1b6   : > { %v426_v59 = vsub.f32 1.5, %v425_v56  ;;  %v348_v5 = vadd.f32 %v346_v57, %v249_v61 }
 0x1b7   : > { %v339_v35 = vmul.f32 %v577_v26, %v338_v16 }
 0x1b8   : > { %v427_v1 = vmul.f32 %v579_v38, %v426_v59  ;;  %v358_v12 = vmul.f32 %v766_v63, %v348_v5 }
 0x1b9   : > { %v581_v2 = vpop.eup %580  ;;  %v343_v10 = vsel %vm790_vm14, %v577_v26, %v339_v35 }
 0x1ba   : > { %v433_v7 = vmul.f32 %v581_v2, %v421_v48  ;;  %v431_v8 = vsel %vm430_vm1, %v579_v38, %v427_v1  ;;  %v345_v19 = vmul.f32 %v343_v10, %v749_v53  ;;  %vm439_vm2 = vweird.f32 %v581_v2 }
 0x1bb   : > { %v442_v11 = vmul.f32 %v431_v8, %v745_v41  ;;  %v450_v21 = vpop.permute.xlu1 %449  ;;  %v360_v24 = vadd.f32 %v358_v12, %v260_v13  ;;  %vm440_vm4 = vmor %vm438_vm3, %vm439_vm2 }
 0x1bc   : > { %v434_v3 = vmul.f32 %v581_v2, %v433_v7  ;;  %v347_v41 = vmul.f32 %v345_v19, %v246_v55 }
 0x1bd   : > { %v444_v15 = vmul.f32 %v442_v11, %v246_v55 }
 0x1be   : > { %v435_v20 = vmul.f32 0.5, %v434_v3  ;;  %v349_v18 = vadd.f32 %v347_v41, %v249_v61 }
 0x1bf   : > { %v446_v22 = vadd.f32 %v444_v15, %v249_v61 }
 0x1c0   : > { %v436_v23 = vsub.f32 1.5, %v435_v20 }
 0x1c1   : > { %v456_v25 = vmul.f32 %v450_v21, %v446_v22  ;;  %v356_v53 = vpop.permute.xlu0 %355 }
 0x1c2   : > { %v437_v29 = vmul.f32 %v581_v2, %v436_v23  ;;  %v359_v17 = vmul.f32 %v356_v53, %v349_v18 }
 0x1c3   : > { %v458_v43 = vadd.f32 %v456_v25, %v360_v24 }
 0x1c4   : > { %v441_v63 = vsel %vm440_vm4, %v581_v2, %v437_v29  ;;  %v361_v36 = vadd.f32 %v359_v17, %v261_v34 }
 0x1c5   : > { %460 = vst.msk [vmem:[%s145_s20] sm:$0xff] %vm194_vm0, %v458_v43  ;;  %v443_v30 = vmul.f32 %v441_v63, %v758_v60 }
 0x1c7   : > { %v445_v31 = vmul.f32 %v443_v30, %v246_v55 }
 0x1c9   : > { %v447_v26 = vadd.f32 %v445_v31, %v249_v61 }
 0x1cb   : > { %v457_v37 = vmul.f32 %v454_v32, %v447_v26 }
 0x1cd   : > { %v459_v38 = vadd.f32 %v457_v37, %v361_v36 }
 0x1cf   : > { %461 = vst.msk [vmem:[%s145_s20 + $0x8] sm:$0xff] %vm194_vm0, %v459_v38 }
 0x1d0 PF: > { %s12_s9 = sadd.s32 1, %s588_s9  }
 0x1d1   : > { %p9_p4 = scmp.ge.s32.totalorder %s12_s9, 4  }
 0x1d3   :  { %11 = sbr.rel (!%p9_p4) target bundleno = 1 (0x1), region = 58 }

</bundles_post_ra>
